<compile_context>
chip_gen: v7x
topology: tpu7x:2x2x1
jax: 0.10.0
libtpu: 0.0.40
codegen_flags: <defaults>
</compile_context>

<pallas_src>
import functools

import jax
import jax.numpy as jnp
from jax.experimental import pallas as pl
from jax.experimental.pallas import tpu as pltpu

_LANES = 128
_SUBLANES = 8
# Spatial rows (of 128 lanes) per grid step: 8192 rows * 128 * 4 B = 4 MiB f32
# per input per step (8 MiB total, 16 MiB double-buffered).
_MAX_BLOCK_ROWS = 8192
# Combined (pred+target) bytes per grid step targeted by batch blocking.
_TARGET_BLOCK_BYTES = 4 * 1024 * 1024


def _iou_kernel(pred_ref, target_ref, loss_ref, inter_acc, pt_acc,
                *, total_valid, block_elems, needs_mask):
    """Streams (b_blk, block_rows, 128) tiles and accumulates per-sample
    Σ sigmoid(p)·t and Σ (sigmoid(p)+t) in (b_blk, 8, 128) accumulators."""
    j = pl.program_id(1)
    last_j = pl.num_programs(1) - 1

    @pl.when(j == 0)
    def _():
        inter_acc[...] = jnp.zeros_like(inter_acc)
        pt_acc[...] = jnp.zeros_like(pt_acc)

    # Upcast in-kernel so narrow (bf16) inputs stay narrow in HBM.
    x = pred_ref[...].astype(jnp.float32)            # (b_blk, block_rows, 128)
    t = target_ref[...].astype(jnp.float32)
    # sigmoid as a single EUP op (tanh) instead of exp + reciprocal.
    p = 0.5 * jnp.tanh(0.5 * x) + 0.5
    inter = p * t
    pt = p + t                                       # union formed in epilogue

    b_blk, block_rows, lanes = inter.shape

    def _accumulate(inter_v, pt_v):
        # Fold the row axis 8 sublanes at a time: layout-preserving reshape +
        # pure vreg+vreg VPU adds; accumulator stays one vreg per sample.
        inter_acc[...] += inter_v.reshape(
            b_blk, block_rows // _SUBLANES, _SUBLANES, lanes).sum(axis=1)
        pt_acc[...] += pt_v.reshape(
            b_blk, block_rows // _SUBLANES, _SUBLANES, lanes).sum(axis=1)

    if needs_mask:
        # Static decision: only emitted when H*W is not a multiple of the
        # block size.  Only the last spatial block can contain invalid
        # elements (128-pad tail / OOB rows), so the mask runs only there.
        @pl.when(j == last_j)
        def _():
            row = jax.lax.broadcasted_iota(jnp.int32, inter.shape, 1)
            lane = jax.lax.broadcasted_iota(jnp.int32, inter.shape, 2)
            # int32 flat index: only overflows for a single sample > 2^31
            # elements, which is implausible.
            flat_idx = j * block_elems + row * lanes + lane
            valid = flat_idx < total_valid
            _accumulate(jnp.where(valid, inter, 0.0),
                        jnp.where(valid, pt, 0.0))

        @pl.when(j != last_j)
        def _():
            _accumulate(inter, pt)
    else:
        _accumulate(inter, pt)

    @pl.when(j == last_j)
    def _():
        i_tot = jnp.sum(jnp.sum(inter_acc[...], axis=2, keepdims=True),
                        axis=1, keepdims=True)              # (b_blk, 1, 1)
        pt_tot = jnp.sum(jnp.sum(pt_acc[...], axis=2, keepdims=True),
                         axis=1, keepdims=True)             # (b_blk, 1, 1)
        u_tot = pt_tot - i_tot
        # Matches the PyTorch reference exactly: union == 0 -> NaN (no eps).
        loss_ref[...] = 1.0 - i_tot / u_tot


def _vmem_limit_bytes():
    # ~3/4 of physical VMEM, capped: ~96 MiB on v5e/v6e (128 MiB physical),
    # ~48 MiB on v7x (64 MiB physical).
    try:
        phys = pltpu.get_tpu_info().vmem_capacity_bytes
        return int(min(phys * 3 // 4, 96 * 1024 * 1024))
    except Exception:
        return 48 * 1024 * 1024


def _per_sample_iou_loss(pred_flat, target_flat, *,
                         max_block_rows=_MAX_BLOCK_ROWS,
                         target_block_bytes=_TARGET_BLOCK_BYTES):
    """pred_flat, target_flat: (N, L) arrays (any float dtype; upcast to f32
    inside the kernel).  Returns (N,) f32 per-sample IoU losses."""
    n, l = pred_flat.shape
    assert target_flat.shape == (n, l)

    p_item = jnp.dtype(pred_flat.dtype).itemsize
    t_item = jnp.dtype(target_flat.dtype).itemsize
    # Sublane alignment for the narrowest input dtype (8 for f32, 16 for bf16,
    # 32 for int8) so every block is made of whole native tiles.
    align = _SUBLANES * (4 // min(p_item, t_item, 4))

    rows = pl.cdiv(l, _LANES)
    rows_pad = pl.cdiv(rows, align) * align
    l_pad = rows_pad * _LANES

    # Batch blocking: group several small samples per grid step so DMAs stay
    # long and the ~0.35 us/step overhead is amortized.
    per_sample_bytes = rows_pad * _LANES * (p_item + t_item)
    if n > 1 and per_sample_bytes < target_block_bytes:
        b_blk = max(1, target_block_bytes // per_sample_bytes)
        # Keep >= 2 batch blocks so the "parallel" axis can feed both
        # TensorCores on v7x.
        b_blk = int(min(b_blk, pl.cdiv(n, 2)))
    else:
        b_blk = 1
    n_blocks = pl.cdiv(n, b_blk)
    n_pad = n_blocks * b_blk

    if l_pad != l:
        # Pad values are irrelevant: the kernel masks everything past `l`.
        pred_flat = jnp.pad(pred_flat, ((0, 0), (0, l_pad - l)))
        target_flat = jnp.pad(target_flat, ((0, 0), (0, l_pad - l)))
    if n_pad != n:
        # Only happens when b_blk > 1, i.e. small per-sample arrays: cheap.
        # Padded samples produce loss=1 and are sliced off below.
        pred_flat = jnp.pad(pred_flat, ((0, n_pad - n), (0, 0)))
        target_flat = jnp.pad(target_flat, ((0, n_pad - n), (0, 0)))

    pred3 = pred_flat.reshape(n_pad, rows_pad, _LANES)
    target3 = target_flat.reshape(n_pad, rows_pad, _LANES)

    block_rows = min(max_block_rows, rows_pad)
    block_rows = max(align, (block_rows // align) * align)
    block_elems = block_rows * _LANES
    num_spatial_blocks = pl.cdiv(rows_pad, block_rows)
    needs_mask = (l % block_elems) != 0

    kernel = functools.partial(
        _iou_kernel, total_valid=l, block_elems=block_elems,
        needs_mask=needs_mask)

    bytes_accessed = (pred3.size * p_item + target3.size * t_item + n_pad * 4)
    cost = pl.CostEstimate(flops=5 * n * l, transcendentals=n * l,
                           bytes_accessed=bytes_accessed)

    loss = pl.pallas_call(
        kernel,
        out_shape=jax.ShapeDtypeStruct((n_pad, 1, 1), jnp.float32),
        grid_spec=pltpu.PrefetchScalarGridSpec(
            num_scalar_prefetch=0,
            grid=(n_blocks, num_spatial_blocks),
            in_specs=[
                pl.BlockSpec((b_blk, block_rows, _LANES),
                             lambda i, j: (i, j, 0)),
                pl.BlockSpec((b_blk, block_rows, _LANES),
                             lambda i, j: (i, j, 0)),
            ],
            out_specs=pl.BlockSpec((b_blk, 1, 1), lambda i, j: (i, 0, 0)),
            scratch_shapes=[
                pltpu.VMEM((b_blk, _SUBLANES, _LANES), jnp.float32),  # Σ p*t
                pltpu.VMEM((b_blk, _SUBLANES, _LANES), jnp.float32),  # Σ p+t
            ],
        ),
        compiler_params=pltpu.CompilerParams(
            dimension_semantics=("parallel", "arbitrary"),
            vmem_limit_bytes=_vmem_limit_bytes(),
        ),
        cost_estimate=cost,
    )(pred3, target3)
    return loss[:n, 0, 0]


class IOULoss:
    """JAX/Pallas port of the PyTorch IOULoss module (forward only).

    compute_dtype: optionally cast pred/target (e.g. to jnp.bfloat16) before
    the kernel to halve HBM traffic; the kernel upcasts to f32 internally.
    Results then differ from the f32 reference at ~1e-3 relative (sigmoid
    input precision) — acceptable for a loss, off by default so semantics
    match the PyTorch reference.
    """

    def __init__(self, weight=None, reduction="mean",
                 loss_name="loss_iou", loss_weight=1.0, compute_dtype=None):
        self.weight = weight
        self.reduction = reduction
        self.loss_weight = loss_weight
        self.compute_dtype = compute_dtype
        self._loss_name = loss_name

    def __call__(self, pred, target):
        # pred: (N, 1, H, W) logits; target: (N, H, W) or (N, 1, H, W)
        if target.ndim == 3:
            target = target[:, None, :, :]
        elif target.ndim != 4:
            raise ValueError(f"Unsupported target dimension: {target.ndim}")

        n = pred.shape[0]
        pred_flat = pred.reshape(n, -1)
        target_flat = target.reshape(n, -1)
        if self.compute_dtype is not None:
            pred_flat = pred_flat.astype(self.compute_dtype)
            target_flat = target_flat.astype(self.compute_dtype)

        loss = _per_sample_iou_loss(pred_flat, target_flat)  # (N,) f32

        if self.weight is not None:
            # Per-sample weighting (weight broadcastable to (N,)), matching
            # weight_reduce_loss applied to the per-sample loss vector.
            loss = loss * jnp.asarray(self.weight, dtype=loss.dtype)

        if self.reduction == "mean":
            loss = jnp.mean(loss)
        elif self.reduction == "sum":
            loss = jnp.sum(loss)
        elif self.reduction == "none":
            pass
        else:
            raise ValueError(f"Unsupported reduction: {self.reduction}")

        return self.loss_weight * loss

    @property
    def loss_name(self):
        return self._loss_name


def _reference_iou_loss(pred, target, reduction="mean", loss_weight=1.0):
    """Pure-JAX reference mirroring the PyTorch code (for verification)."""
    if target.ndim == 3:
        target = target[:, None, :, :]
    p = jax.nn.sigmoid(pred.astype(jnp.float32))
    t = target.astype(jnp.float32)
    inter = p * t
    loss = jnp.sum(inter, axis=(1, 2, 3)) / jnp.sum(p + t - inter,
                                                    axis=(1, 2, 3))
    loss = 1.0 - loss
    if reduction == "mean":
        loss = jnp.mean(loss)
    elif reduction == "sum":
        loss = jnp.sum(loss)
    return loss_weight * loss


if __name__ == "__main__":
    key = jax.random.PRNGKey(0)
    ks = jax.random.split(key, 10)

    # Case 1: (N, 1, H, W) logits + 4-D target, 'mean' reduction.
    N, C, H, W = 2, 1, 16, 16
    pred = jax.random.normal(ks[0], (N, C, H, W), dtype=jnp.float32)
    target = (jax.random.uniform(ks[1], (N, C, H, W)) > 0.5).astype(jnp.float32)
    out = jax.block_until_ready(IOULoss(reduction="mean")(pred, target))
    ref = _reference_iou_loss(pred, target, reduction="mean")
    assert jnp.allclose(out, ref, rtol=1e-5, atol=1e-6), (out, ref)

    # Case 2: 3-D target, H*W not a multiple of 128 (tail mask) + batch
    # blocking with a padded batch tail, 'none' reduction + loss_weight.
    N2, H2, W2 = 3, 10, 12
    pred2 = jax.random.normal(ks[2], (N2, 1, H2, W2), dtype=jnp.float32)
    target2 = (jax.random.uniform(ks[3], (N2, H2, W2)) > 0.5).astype(jnp.float32)
    out2 = jax.block_until_ready(
        IOULoss(reduction="none", loss_weight=2.0)(pred2, target2))
    ref2 = _reference_iou_loss(pred2, target2, reduction="none", loss_weight=2.0)
    assert jnp.allclose(out2, ref2, rtol=1e-5, atol=1e-6), (out2, ref2)

    # Case 3: multi-block spatial reduction with a partial last block (small
    # max_block_rows override to exercise the accumulator + gated-mask path).
    N3, L3 = 2, 48 * 48
    pred3 = jax.random.normal(ks[4], (N3, L3), dtype=jnp.float32)
    target3 = (jax.random.uniform(ks[5], (N3, L3)) > 0.5).astype(jnp.float32)
    out3 = jax.block_until_ready(
        _per_sample_iou_loss(pred3, target3, max_block_rows=8))
    p3 = jax.nn.sigmoid(pred3)
    inter3 = p3 * target3
    ref3 = 1.0 - inter3.sum(-1) / (p3 + target3 - inter3).sum(-1)
    assert jnp.allclose(out3, ref3, rtol=1e-5, atol=1e-6), (out3, ref3)

    # Case 4: batch blocking (b_blk > 1) + batch padding, small images.
    N4 = 5
    pred4 = jax.random.normal(ks[6], (N4, 1, 16, 16), dtype=jnp.float32)
    target4 = (jax.random.uniform(ks[7], (N4, 16, 16)) > 0.5).astype(jnp.float32)
    out4 = jax.block_until_ready(IOULoss(reduction="sum")(pred4, target4))
    ref4 = _reference_iou_loss(pred4, target4, reduction="sum")
    assert jnp.allclose(out4, ref4, rtol=1e-5, atol=1e-6), (out4, ref4)

    # Case 5: batch blocking AND multiple spatial blocks simultaneously
    # (exact division, no mask).
    N5, L5 = 6, 2048
    pred5 = jax.random.normal(ks[8], (N5, L5), dtype=jnp.float32)
    target5 = (jax.random.uniform(ks[9], (N5, L5)) > 0.5).astype(jnp.float32)
    out5 = jax.block_until_ready(
        _per_sample_iou_loss(pred5, target5, max_block_rows=8,
                             target_block_bytes=64 * 1024))
    p5 = jax.nn.sigmoid(pred5)
    inter5 = p5 * target5
    ref5 = 1.0 - inter5.sum(-1) / (p5 + target5 - inter5).sum(-1)
    assert jnp.allclose(out5, ref5, rtol=1e-5, atol=1e-6), (out5, ref5)

    # Case 6: optional bf16 streaming mode (halves HBM traffic); looser
    # tolerance because the sigmoid inputs are bf16-rounded.
    out6 = jax.block_until_ready(
        IOULoss(reduction="mean", compute_dtype=jnp.bfloat16)(pred, target))
    assert jnp.allclose(out6, ref, rtol=2e-2, atol=2e-2), (out6, ref)

    print("KERNEL_OK")
</pallas_src>

<mosaic_0001>
module attributes {stable_mosaic.version = 11 : i64} {
  func.func @_iou_kernel(%arg0: i32, %arg1: i32, %arg2: memref<1x8x128xf32, #tpu.memory_space<vmem>>, %arg3: memref<1x8x128xf32, #tpu.memory_space<vmem>>, %arg4: memref<1x1x1xf32, #tpu.memory_space<vmem>>, %arg5: memref<1x8x128xf32, #tpu.memory_space<vmem>>, %arg6: memref<1x8x128xf32, #tpu.memory_space<vmem>>) attributes {dimension_semantics = [#tpu.dimension_semantics<parallel>, #tpu.dimension_semantics<arbitrary>], iteration_bounds = array<i64: 2, 1>, scalar_prefetch = 0 : i64, scratch_operands = 2 : i64, tpu.core_type = #tpu.core_type<tc>, window_params = [{transform_indices = @transform_0, window_bounds = array<i64: 1, 8, 128>}, {transform_indices = @transform_1, window_bounds = array<i64: 1, 8, 128>}, {transform_indices = @transform_2, window_bounds = array<i64: 1, 1, 1>}]} {
    %c0_i32 = arith.constant 0 : i32
    %0 = arith.cmpi eq, %arg1, %c0_i32 : i32
    %1 = arith.extui %0 : i1 to i32
    %c0_i32_0 = arith.constant 0 : i32
    %2 = arith.cmpi ne, %1, %c0_i32_0 : i32
    scf.if %2 {
      %cst_14 = arith.constant 0.000000e+00 : f32
      %23 = vector.broadcast %cst_14 : f32 to vector<1x8x128xf32>
      %c0_15 = arith.constant 0 : index
      %c0_16 = arith.constant 0 : index
      %c0_17 = arith.constant 0 : index
      %24 = vector.load %arg5[%c0_15, %c0_16, %c0_17] : memref<1x8x128xf32, #tpu.memory_space<vmem>>, vector<1x8x128xf32>
      tpu.vector_store %arg5[%c0_15, %c0_16, %c0_17], %23 {strides = array<i32>} : memref<1x8x128xf32, #tpu.memory_space<vmem>>, vector<1x8x128xf32>,
      %cst_18 = arith.constant 0.000000e+00 : f32
      %25 = vector.broadcast %cst_18 : f32 to vector<1x8x128xf32>
      %c0_19 = arith.constant 0 : index
      %c0_20 = arith.constant 0 : index
      %c0_21 = arith.constant 0 : index
      %26 = vector.load %arg6[%c0_19, %c0_20, %c0_21] : memref<1x8x128xf32, #tpu.memory_space<vmem>>, vector<1x8x128xf32>
      tpu.vector_store %arg6[%c0_19, %c0_20, %c0_21], %25 {strides = array<i32>} : memref<1x8x128xf32, #tpu.memory_space<vmem>>, vector<1x8x128xf32>,
    } else {
    }
    %c0 = arith.constant 0 : index
    %c0_1 = arith.constant 0 : index
    %c0_2 = arith.constant 0 : index
    %3 = vector.load %arg2[%c0, %c0_1, %c0_2] : memref<1x8x128xf32, #tpu.memory_space<vmem>>, vector<1x8x128xf32>
    %c0_3 = arith.constant 0 : index
    %c0_4 = arith.constant 0 : index
    %c0_5 = arith.constant 0 : index
    %4 = vector.load %arg3[%c0_3, %c0_4, %c0_5] : memref<1x8x128xf32, #tpu.memory_space<vmem>>, vector<1x8x128xf32>
    %cst = arith.constant 5.000000e-01 : f32
    %5 = vector.broadcast %cst : f32 to vector<1x8x128xf32>
    %6 = arith.mulf %5, %3 : vector<1x8x128xf32>
    %7 = math.tanh %6 : vector<1x8x128xf32>
    %cst_6 = arith.constant 5.000000e-01 : f32
    %8 = vector.broadcast %cst_6 : f32 to vector<1x8x128xf32>
    %9 = arith.mulf %8, %7 : vector<1x8x128xf32>
    %cst_7 = arith.constant 5.000000e-01 : f32
    %10 = vector.broadcast %cst_7 : f32 to vector<1x8x128xf32>
    %11 = arith.addf %9, %10 : vector<1x8x128xf32>
    %12 = arith.mulf %11, %4 : vector<1x8x128xf32>
    %13 = arith.addf %11, %4 : vector<1x8x128xf32>
    %c0_i32_8 = arith.constant 0 : i32
    %14 = arith.cmpi eq, %arg1, %c0_i32_8 : i32
    %15 = arith.extui %14 : i1 to i32
    %c0_i32_9 = arith.constant 0 : i32
    %16 = arith.cmpi ne, %15, %c0_i32_9 : i32
    scf.if %16 {
      %23 = tpu.iota {dimensions = array<i32: 1>} : vector<1x8x128xi32>
      %24 = tpu.iota {dimensions = array<i32: 2>} : vector<1x8x128xi32>
      %c1024_i32 = arith.constant 1024 : i32
      %25 = arith.muli %arg1, %c1024_i32 : i32
      %c128_i32 = arith.constant 128 : i32
      %26 = vector.broadcast %c128_i32 : i32 to vector<1x8x128xi32>
      %27 = arith.muli %23, %26 : vector<1x8x128xi32>
      %28 = vector.broadcast %25 : i32 to vector<1x8x128xi32>
      %29 = arith.addi %28, %27 : vector<1x8x128xi32>
      %30 = arith.addi %29, %24 : vector<1x8x128xi32>
      %c256_i32 = arith.constant 256 : i32
      %31 = vector.broadcast %c256_i32 : i32 to vector<1x8x128xi32>
      %32 = arith.cmpi slt, %30, %31 : vector<1x8x128xi32>
      %cst_14 = arith.constant 0.000000e+00 : f32
      %33 = vector.broadcast %cst_14 : f32 to vector<1x8x128xf32>
      %34 = arith.select %32, %12, %33 : vector<1x8x128xi1>, vector<1x8x128xf32>
      %cst_15 = arith.constant 0.000000e+00 : f32
      %35 = vector.broadcast %cst_15 : f32 to vector<1x8x128xf32>
      %36 = arith.select %32, %13, %35 : vector<1x8x128xi1>, vector<1x8x128xf32>
      %c0_16 = arith.constant 0 : index
      %c0_17 = arith.constant 0 : index
      %c0_18 = arith.constant 0 : index
      %37 = vector.load %arg5[%c0_16, %c0_17, %c0_18] : memref<1x8x128xf32, #tpu.memory_space<vmem>>, vector<1x8x128xf32>
      %38 = vector.shape_cast %34 : vector<1x8x128xf32> to vector<1x1x8x128xf32>
      %cst_19 = arith.constant dense<0.000000e+00> : vector<1x8x128xf32>
      %39 = vector.multi_reduction <add>, %38, %cst_19 [1] : vector<1x1x8x128xf32> to vector<1x8x128xf32>
      %40 = arith.addf %37, %39 : vector<1x8x128xf32>
      %c0_20 = arith.constant 0 : index
      %c0_21 = arith.constant 0 : index
      %c0_22 = arith.constant 0 : index
      %41 = vector.load %arg5[%c0_20, %c0_21, %c0_22] : memref<1x8x128xf32, #tpu.memory_space<vmem>>, vector<1x8x128xf32>
      tpu.vector_store %arg5[%c0_20, %c0_21, %c0_22], %40 {strides = array<i32>} : memref<1x8x128xf32, #tpu.memory_space<vmem>>, vector<1x8x128xf32>,
      %c0_23 = arith.constant 0 : index
      %c0_24 = arith.constant 0 : index
      %c0_25 = arith.constant 0 : index
      %42 = vector.load %arg6[%c0_23, %c0_24, %c0_25] : memref<1x8x128xf32, #tpu.memory_space<vmem>>, vector<1x8x128xf32>
      %43 = vector.shape_cast %36 : vector<1x8x128xf32> to vector<1x1x8x128xf32>
      %cst_26 = arith.constant dense<0.000000e+00> : vector<1x8x128xf32>
      %44 = vector.multi_reduction <add>, %43, %cst_26 [1] : vector<1x1x8x128xf32> to vector<1x8x128xf32>
      %45 = arith.addf %42, %44 : vector<1x8x128xf32>
      %c0_27 = arith.constant 0 : index
      %c0_28 = arith.constant 0 : index
      %c0_29 = arith.constant 0 : index
      %46 = vector.load %arg6[%c0_27, %c0_28, %c0_29] : memref<1x8x128xf32, #tpu.memory_space<vmem>>, vector<1x8x128xf32>
      tpu.vector_store %arg6[%c0_27, %c0_28, %c0_29], %45 {strides = array<i32>} : memref<1x8x128xf32, #tpu.memory_space<vmem>>, vector<1x8x128xf32>,
    } else {
    }
    %c0_i32_10 = arith.constant 0 : i32
    %17 = arith.cmpi ne, %arg1, %c0_i32_10 : i32
    %18 = arith.extui %17 : i1 to i32
    %c0_i32_11 = arith.constant 0 : i32
    %19 = arith.cmpi ne, %18, %c0_i32_11 : i32
    scf.if %19 {
      %c0_14 = arith.constant 0 : index
      %c0_15 = arith.constant 0 : index
      %c0_16 = arith.constant 0 : index
      %23 = vector.load %arg5[%c0_14, %c0_15, %c0_16] : memref<1x8x128xf32, #tpu.memory_space<vmem>>, vector<1x8x128xf32>
      %24 = vector.shape_cast %12 : vector<1x8x128xf32> to vector<1x1x8x128xf32>
      %cst_17 = arith.constant dense<0.000000e+00> : vector<1x8x128xf32>
      %25 = vector.multi_reduction <add>, %24, %cst_17 [1] : vector<1x1x8x128xf32> to vector<1x8x128xf32>
      %26 = arith.addf %23, %25 : vector<1x8x128xf32>
      %c0_18 = arith.constant 0 : index
      %c0_19 = arith.constant 0 : index
      %c0_20 = arith.constant 0 : index
      %27 = vector.load %arg5[%c0_18, %c0_19, %c0_20] : memref<1x8x128xf32, #tpu.memory_space<vmem>>, vector<1x8x128xf32>
      tpu.vector_store %arg5[%c0_18, %c0_19, %c0_20], %26 {strides = array<i32>} : memref<1x8x128xf32, #tpu.memory_space<vmem>>, vector<1x8x128xf32>,
      %c0_21 = arith.constant 0 : index
      %c0_22 = arith.constant 0 : index
      %c0_23 = arith.constant 0 : index
      %28 = vector.load %arg6[%c0_21, %c0_22, %c0_23] : memref<1x8x128xf32, #tpu.memory_space<vmem>>, vector<1x8x128xf32>
      %29 = vector.shape_cast %13 : vector<1x8x128xf32> to vector<1x1x8x128xf32>
      %cst_24 = arith.constant dense<0.000000e+00> : vector<1x8x128xf32>
      %30 = vector.multi_reduction <add>, %29, %cst_24 [1] : vector<1x1x8x128xf32> to vector<1x8x128xf32>
      %31 = arith.addf %28, %30 : vector<1x8x128xf32>
      %c0_25 = arith.constant 0 : index
      %c0_26 = arith.constant 0 : index
      %c0_27 = arith.constant 0 : index
      %32 = vector.load %arg6[%c0_25, %c0_26, %c0_27] : memref<1x8x128xf32, #tpu.memory_space<vmem>>, vector<1x8x128xf32>
      tpu.vector_store %arg6[%c0_25, %c0_26, %c0_27], %31 {strides = array<i32>} : memref<1x8x128xf32, #tpu.memory_space<vmem>>, vector<1x8x128xf32>,
    } else {
    }
    %c0_i32_12 = arith.constant 0 : i32
    %20 = arith.cmpi eq, %arg1, %c0_i32_12 : i32
    %21 = arith.extui %20 : i1 to i32
    %c0_i32_13 = arith.constant 0 : i32
    %22 = arith.cmpi ne, %21, %c0_i32_13 : i32
    scf.if %22 {
      %c0_14 = arith.constant 0 : index
      %c0_15 = arith.constant 0 : index
      %c0_16 = arith.constant 0 : index
      %23 = vector.load %arg5[%c0_14, %c0_15, %c0_16] : memref<1x8x128xf32, #tpu.memory_space<vmem>>, vector<1x8x128xf32>
      %cst_17 = arith.constant dense<0.000000e+00> : vector<1x8xf32>
      %24 = vector.multi_reduction <add>, %23, %cst_17 [2] : vector<1x8x128xf32> to vector<1x8xf32>
      %25 = vector.shape_cast %24 : vector<1x8xf32> to vector<1x8x1xf32>
      %cst_18 = arith.constant dense<0.000000e+00> : vector<1x1xf32>
      %26 = vector.multi_reduction <add>, %25, %cst_18 [1] : vector<1x8x1xf32> to vector<1x1xf32>
      %27 = vector.shape_cast %26 : vector<1x1xf32> to vector<1x1x1xf32>
      %c0_19 = arith.constant 0 : index
      %c0_20 = arith.constant 0 : index
      %c0_21 = arith.constant 0 : index
      %28 = vector.load %arg6[%c0_19, %c0_20, %c0_21] : memref<1x8x128xf32, #tpu.memory_space<vmem>>, vector<1x8x128xf32>
      %cst_22 = arith.constant dense<0.000000e+00> : vector<1x8xf32>
      %29 = vector.multi_reduction <add>, %28, %cst_22 [2] : vector<1x8x128xf32> to vector<1x8xf32>
      %30 = vector.shape_cast %29 : vector<1x8xf32> to vector<1x8x1xf32>
      %cst_23 = arith.constant dense<0.000000e+00> : vector<1x1xf32>
      %31 = vector.multi_reduction <add>, %30, %cst_23 [1] : vector<1x8x1xf32> to vector<1x1xf32>
      %32 = vector.shape_cast %31 : vector<1x1xf32> to vector<1x1x1xf32>
      %33 = arith.subf %32, %27 : vector<1x1x1xf32>
      %34 = arith.divf %27, %33 : vector<1x1x1xf32>
      %cst_24 = arith.constant 1.000000e+00 : f32
      %35 = vector.broadcast %cst_24 : f32 to vector<1x1x1xf32>
      %36 = arith.subf %35, %34 : vector<1x1x1xf32>
      %c0_25 = arith.constant 0 : index
      %c0_26 = arith.constant 0 : index
      %c0_27 = arith.constant 0 : index
      %37 = vector.load %arg4[%c0_25, %c0_26, %c0_27] : memref<1x1x1xf32, #tpu.memory_space<vmem>>, vector<1x1x1xf32>
      tpu.vector_store %arg4[%c0_25, %c0_26, %c0_27], %36 {strides = array<i32>} : memref<1x1x1xf32, #tpu.memory_space<vmem>>, vector<1x1x1xf32>,
    } else {
    }
    return
  }
  func.func @transform_0(%arg0: i32, %arg1: i32) -> (i32, i32, i32) {
    %c0_i32 = arith.constant 0 : i32
    %c0_i32_0 = arith.constant 0 : i32
    return %arg0, %arg1, %c0_i32 : i32, i32, i32
  }
  func.func @transform_1(%arg0: i32, %arg1: i32) -> (i32, i32, i32) {
    %c0_i32 = arith.constant 0 : i32
    %c0_i32_0 = arith.constant 0 : i32
    return %arg0, %arg1, %c0_i32 : i32, i32, i32
  }
  func.func @transform_2(%arg0: i32, %arg1: i32) -> (i32, i32, i32) {
    %c0_i32 = arith.constant 0 : i32
    %c0_i32_0 = arith.constant 0 : i32
    %c0_i32_1 = arith.constant 0 : i32
    return %arg0, %c0_i32, %c0_i32_0 : i32, i32, i32
  }
}

</mosaic_0001>

<bundles_post_ra>
// kernel: tpu_custom_call.1
= control target key start
LH: loop header
LB: loop body
LE: loop exit
PB: predicated region body
PF: predicated region fallthrough
CT: control target
= control target key end

     0   :  { %7 = vsyncpa [#allocation5], 0  ;;  %s762_s0 = inlined_call_operand.hbm [shape: f32[2,8,128], index: 0, kind: input, shape index: {}]   ;;  %s763_s1 = inlined_call_operand.hbm [shape: f32[2,8,128], index: 1, kind: input, shape index: {}]   ;;  %s764_s2 = inlined_call_operand.vmem [shape: f32[2,1,1], index: 2, kind: output, shape index: {}]  }
   0x1   :  { %9 = vsyncpa [#allocation5 + $0x1], 0 }
   0x2   :  { %10 = vsyncpa [#allocation7], 0 }
   0x3   :  { %12 = vsyncpa [#allocation7 + $0x1], 0  ;;  %s590_s9 = smov 0   ;;  %s592_s10 = smov 0  }
   0x4   :  { %s594_s11 = smov 0   ;;  %s596_s12 = smov 0  }
   0x5   :  { %s598_s13 = smov 0   ;;  %s600_s14 = smov 0  }
   0x6 LB: > { %s380_s15 = sadd.s32 4294967295, %s571_s14   ;;  %s30_s16 = sadd.s32 1, %s567_s13  ;;  %s571_s14 = sphi %s600_s14, %s18_s14   ;;  %s567_s13 = sphi %s598_s13, %s778_s13   ;;  %s563_s12 = sphi %s596_s12, %s777_s12   ;;  %s559_s11 = sphi %s594_s11, %s776_s11   ;;  %s555_s10 = sphi %s592_s10, %s775_s10   ;;  %s551_s9 = sphi %s590_s9, %s774_s9  }
   0x7   : > { %p32_p0 = scmp.ge.s32.totalorder %s30_s16, 2  ;;  %s39_s17 = sadd.s32 1, %s559_s11 }
   0x8   : > { %p46_p1 = scmp.ne.s32.totalorder %s559_s11, %s555_s10  ;;  %p47_p2 = scmp.eq.s32.totalorder %s571_s14, 0 }
   0x9   : > { %s780_s16 = smov (%p32_p0, %s30_s16), 0  ;;  %p52_p4 = scmp.ne.s32.totalorder %s555_s10, %s551_s9 }
   0xa   : > { %p626_p3 = por %p47_p2, %p46_p1  ;;  %s34_s19 = ssub.s32 %s567_s13, %s780_s16 }
   0xb   : > { %p53_p5 = scmp.eq.s32.totalorder %s380_s15, 0  ;;  %p37_p6 = scmp.eq.s32.totalorder %s34_s19, 0 }
   0xc   : > { %p404_p8 = scmp.lt.s32.totalorder %s571_s14, 2  ;;  %s642_s22 = sand.u32 1, %s559_s11  }
   0xd   : > { %p633_p7 = por %p53_p5, %p52_p4  ;;  %s385_s23 = sshll.u32 %s567_s13, 7 }
   0xe   : > { %s639_s21 = scalar_select %p37_p6, %s559_s11, %s39_s17  }
   0xf   : > { %s767_s20 = scalar_select %p633_p7, 1, 0 }
  0x10   : > { %s384_s24 = sshll.u32 %s642_s22, 3  ;;  %s651_s27 = scalar_lea.hbm %s762_s0, %s385_s23 }
  0x11   : > { %s134_s28 = scalar_lea.vmem [#allocation4], %s384_s24  ;;  %p657_p9 = pnand %p404_p8, %p626_p3 }
  0x12   : > { %s142_s29 = sshll.u32 %s134_s28, 4  ;;  %s131_s3 = scalar_lea.sflag [#allocation5], %s642_s22  ;;  %s661_s29 = int_to_ptr.vmem [resolvable:$true] %s142_s29 }
  0x13   : > { %s457_s4 = scalar_lea.hbm %s651_s27, 128  ;;  %p459_p13 = pneg %p657_p9 }
  0x14   : > { %p458_p12 = scmp.ne.s32.totalorder %s651_s27, %s457_s4  ;;  %s462_s7 = scalar_lea.hbm %s762_s0, 256 }
  0x15   : > { %p463_p2 = scmp.lt.u32.totalorder %s651_s27, %s762_s0  ;;  %p464_p3 = scmp.lt.u32.totalorder %s462_s7, %s457_s4 }
  0x16   : > { %p460_p0 = pnand %p459_p13, %p458_p12  ;;  %p466_p5 = scmp.lt.u32.totalorder %s457_s4, %s651_s27 }
  0x17   : > { %p465_p4 = por %p464_p3, %p463_p2 }
  0x18   : > { %p461_p1 = pneg %p460_p0 }
  0x19   : > { %p467_p6 = por %p466_p5, %p465_p4 }
  0x1b   : > { %p468_p8 = pnand %p467_p6, %p461_p1 }
  0x1d   : > { %471 = shalt.err (!%p468_p8)
}
  0x1e   : > { %s472_s15 = scalar_lea.vmem %s661_s29, 128  ;;  %s573_s17 = smov [#allocation4]  }
  0x1f   : > { %p473_p12 = scmp.ne.s32.totalorder %s661_s29, %s472_s15  ;;  %s477_s18 = sshll.u32 %s573_s17, 4  ;;  %s478_s18 = int_to_ptr.vmem [resolvable:$false] %s477_s18 }
  0x20   : > { %s479_s19 = scalar_lea.vmem %s478_s18, 256  ;;  %p480_p11 = scmp.lt.s32.totalorder %s661_s29, %s478_s18 }
  0x21   : > { %p475_p0 = pnand %p473_p12, %p459_p13  ;;  %p481_p2 = scmp.lt.s32.totalorder %s479_s19, %s472_s15 }
  0x23   : > { %p476_p10 = pneg %p475_p0  ;;  %p482_p3 = por %p481_p2, %p480_p11 }
  0x25   : > { %p483_p4 = pnand %p482_p3, %p476_p10 }
  0x27   : > { %486 = shalt.err (!%p483_p4)
}
  0x28   : > { %400 = dma.hbm_to_vmem [thread:$0]  (!%p657_p9), %s651_s27, 128, %s661_s29, %s131_s3  }
  0x29   : > { %p769_p1 = scmp.lt.s32.totalorder %s571_s14, 3  ;;  %p770_p5 = scmp.ge.s32.totalorder %s571_s14, 1 }
  0x2a   : > { %s704_s4 = scalar_lea.hbm %s763_s1, %s385_s23  ;;  %s153_s5 = scalar_lea.vmem [#allocation6], %s384_s24 }
  0x2b   : > { %p695_p6 = pnand %p770_p5, %p769_p1  ;;  %s161_s6 = sshll.u32 %s153_s5, 4  ;;  %s162_s6 = int_to_ptr.vmem [resolvable:$true] %s161_s6 }
  0x2c   : > { %s150_s27 = scalar_lea.sflag [#allocation7], %s642_s22  ;;  %s487_s29 = scalar_lea.hbm %s704_s4, 128 }
  0x2d   : > { %s771_s25 = scalar_select %p695_p6, 1, 0 }
  0x2e   : > { %p488_p10 = scmp.ne.s32.totalorder %s704_s4, %s487_s29  ;;  %s492_s23 = scalar_lea.hbm %s763_s1, 256 }
  0x2f   : > { %p493_p12 = scmp.lt.u32.totalorder %s704_s4, %s763_s1  ;;  %p494_p0 = scmp.lt.u32.totalorder %s492_s23, %s487_s29 }
  0x30   : > { %p490_p11 = pnand %p488_p10, %p459_p13  ;;  %p496_p3 = scmp.lt.u32.totalorder %s487_s29, %s704_s4 }
  0x31   : > { %p495_p2 = por %p494_p0, %p493_p12 }
  0x32   : > { %p491_p8 = pneg %p490_p11 }
  0x33   : > { %p497_p4 = por %p496_p3, %p495_p2 }
  0x35   : > { %p498_p1 = pnand %p497_p4, %p491_p8 }
  0x37   : > { %501 = shalt.err (!%p498_p1)
}
  0x38   : > { %s502_s22 = scalar_lea.vmem %s162_s6, 128  ;;  %s574_s24 = smov [#allocation6]  }
  0x39   : > { %p503_p5 = scmp.ne.s32.totalorder %s162_s6, %s502_s22  ;;  %s507_s15 = sshll.u32 %s574_s24, 4  ;;  %s508_s15 = int_to_ptr.vmem [resolvable:$false] %s507_s15 }
  0x3a   : > { %s509_s17 = scalar_lea.vmem %s508_s15, 256  ;;  %p510_p7 = scmp.lt.s32.totalorder %s162_s6, %s508_s15 }
  0x3b   : > { %p505_p10 = pnand %p503_p5, %p459_p13  ;;  %p511_p6 = scmp.lt.s32.totalorder %s509_s17, %s502_s22 }
  0x3d   : > { %p506_p11 = pneg %p505_p10  ;;  %p512_p0 = por %p511_p6, %p510_p7 }
  0x3f   : > { %p513_p12 = pnand %p512_p0, %p506_p11 }
  0x41   : > { %516 = shalt.err (!%p513_p12)
}
  0x42   : > { %403 = dma.hbm_to_vmem [thread:$0]  (!%p657_p9), %s704_s4, 128, %s162_s6, %s150_s27  }
  0x43   : > { %p772_p8 = scmp.ne.s32.totalorder %s771_s25, 0 }
  0x44   : > { %s172_s18 = sand.u32 (!%p772_p8), 1, %s555_s10   ;;  %p773_p13 = scmp.ne.s32.totalorder (!%p772_p8), %s767_s20, 0 }
  0x45   : > { %170 = sbr.rel (%p772_p8) target bundleno = 276 (0x114), region = 28  ;;  %s389_s19 = sshll.u32 (!%p772_p8), %s172_s18, 3 }
  0x46   : > { %s173_s26 = scalar_lea.sflag (!%p772_p8), [#allocation5], %s172_s18  ;;  %s176_s28 = scalar_lea.vmem (!%p772_p8), [#allocation4], %s389_s19 }
  0x4c   : > { %542 = dma.done.wait (%p773_p13), %s173_s26, 128  }
  0x4d   : > { %544 = vsyncadd (%p773_p13), %s173_s26, 4294967168  ;;  %s182_s5 = scalar_lea.sflag [#allocation7], %s172_s18  ;;  %s185_s29 = scalar_lea.vmem [#allocation6], %s389_s19 }
  0x4e   : > { %546 = dma.done.wait (%p773_p13), %s182_s5, 128  }
  0x4f   : > { %548 = vsyncadd (%p773_p13), %s182_s5, 4294967168  ;;  %v218_v0 = vld [vmem:[%s176_s28] sm:$0xff]  ;;  %v229_v2 = vlaneseq  ;;  %v219_v9 = vld [vmem:[%s185_s29] sm:$0xff]  ;;  %p209_p7 = scmp.lt.s32.totalorder %s563_s12, 1  ;;  %vm286_vm1 = vcmask 0  }
  0x50   : > { %v220_v1 = vmul.f32 0.5, %v218_v0 }
  0x51   : > { %v230_v3 = vshrl.u32 %v229_v2, 7  ;;  %v232_v4 = vand.u32 127, %v229_v2  ;;  %s782_s12 = smov (!%p209_p7, %s563_s12), 1 }
  0x52   : > { %453 = vtanh.f32 %v220_v1  ;;  %s211_s25 = scalar_lea.vmem %s764_s2, %s782_s12 }
  0x53   : > { %v234_v5 = vmul.u32 128, %v230_v3 }
  0x55   : > { %v237_v7 = vadd.s32 %v234_v5, %v232_v4 }
  0x57   : > { %vm238_vm0 = vcmp.lt.s32.totalorder %v237_v7, 256 }
  0x5c   : > { %v454_v6 = vpop.eup %453 }
  0x5d   : > { %v222_v8 = vmul.f32 0.5, %v454_v6 }
  0x5f   : > { %v223_v10 = vadd.f32 0.5, %v222_v8 }
  0x61   : > { %v224_v11 = vmul.f32 %v223_v10, %v219_v9  ;;  %v225_v12 = vadd.f32 %v223_v10, %v219_v9 }
  0x63   : > { %v239_v13 = vsel %vm238_vm0, %v224_v11, 0.0  ;;  %v240_v14 = vsel %vm238_vm0, %v225_v12, 0.0 }
  0x64   : > { %265 = vadd.xlane.f32.xlu0 %v239_v13 }
  0x68   : > { %274 = vadd.xlane.f32.xlu0 %v240_v14 }
  0xf1   : > { %v266_v15 = vpop.xlane.xlu0 %265 }
  0xf2   : > { %v267_v16 = vrot.slane %v266_v15, 4 }
  0xf4   : > { %v268_v17 = vadd.f32 %v267_v16, %v266_v15 }
  0xf5   : > { %v275_v18 = vpop.xlane.xlu0 %274 }
  0xf6   : > { %v269_v19 = vrot.slane %v268_v17, 2  ;;  %v276_v20 = vrot.slane %v275_v18, 4 }
  0xf8   : > { %v270_v21 = vadd.f32 %v269_v19, %v268_v17  ;;  %v277_v22 = vadd.f32 %v276_v20, %v275_v18 }
  0xfa   : > { %v278_v23 = vrot.slane %v277_v22, 2  ;;  %v271_v24 = vrot.slane %v270_v21, 1 }
  0xfc   : > { %v279_v25 = vadd.f32 %v278_v23, %v277_v22  ;;  %v272_v27 = vadd.f32 %v271_v24, %v270_v21 }
  0xfe   : > { %v280_v26 = vrot.slane %v279_v25, 1 }
 0x100   : > { %v281_v28 = vadd.f32 %v280_v26, %v279_v25 }
 0x102   : > { %v282_v29 = vsub.f32 %v281_v28, %v272_v27 }
 0x104   : > { %455 = vrcp.f32 %v282_v29 }
 0x10e   : > { %v456_v30 = vpop.eup %455 }
 0x10f   : > { %v284_v31 = vmul.f32 %v456_v30, %v272_v27 }
 0x111   : > { %v285_v32 = vsub.f32 1.0, %v284_v31 }
 0x113   : > { %287 = vst.msk [vmem:[%s211_s25] sm:$0x1] %vm286_vm1, %v285_v32 }
 0x114 PF: > { %s18_s14 = sadd.s32 1, %s571_s14   ;;  %s774_s9 = smov %s555_s10 }
 0x115   : > { %p15_p9 = scmp.ge.s32.totalorder %s18_s14, 4   ;;  %s775_s10 = smov %s559_s11 }
 0x116   : > { %s776_s11 = smov %s639_s21  ;;  %s777_s12 = smov %s567_s13 }
 0x117   : > { %s778_s13 = smov %s780_s16  ;;  %17 = sbr.rel (!%p15_p9) target bundleno = 6 (0x6), region = 97 }
 0x11e   :  { %305 = vsyncpa [#allocation5], 1 }
 0x11f   :  { %307 = vsyncpa [#allocation5 + $0x1], 1 }
 0x120   :  { %308 = vsyncpa [#allocation7], 1 }
 0x121   :  { %310 = vsyncpa [#allocation7 + $0x1], 1 }

</bundles_post_ra>
